<compile_context>
chip_gen: v5e
topology: v5e:2x2
jax: 0.10.0
libtpu: 0.0.40
codegen_flags: <defaults>
</compile_context>

<pallas_src>
import jax
import jax.numpy as jnp
from jax.experimental import pallas as pl
from jax.experimental.pallas import tpu as pltpu


def _round_up(x: int, m: int) -> int:
    return ((x + m - 1) // m) * m


def _cdiv(a: int, b: int) -> int:
    return (a + b - 1) // b


def _pick_tm(n_rows: int) -> int:
    """Row-tile size: ~512 target, >=2 tiles when possible (v7x megacore),
    multiples of 128 (MXU-friendly) or 8 (sublane) for small N, balanced to
    minimize wasted rows in the last (masked) partial block."""
    if n_rows <= 16:
        return _round_up(max(n_rows, 1), 8)
    n_tiles = max(2, _cdiv(n_rows, 512))
    per = _cdiv(n_rows, n_tiles)
    gran = 128 if per >= 128 else 8
    return min(_round_up(per, gran), 512)


def _pick_div(padded: int, cap: int) -> int:
    """Largest 128-multiple tile <= cap that divides `padded` (padded % 128 == 0)."""
    for cand in (2048, 1024, 512, 256, 128):
        if cand <= cap and padded % cand == 0:
            return cand
    return 128


# ---------------- Path A: resident-weight kernel (weight fits VMEM) ----------------
def _linear_resident_kernel(x_ref, w_ref, b_ref, o_ref):
    # x: (tm, F_in), w: (F_in, F_out) resident (constant index_map -> DMA'd once),
    # b: (1, F_out), o: (tm, F_out).  Single dot per grid step, f32 accumulate on MXU.
    acc = jnp.dot(x_ref[...], w_ref[...], preferred_element_type=jnp.float32)
    o_ref[...] = (acc + b_ref[...].astype(jnp.float32)).astype(o_ref.dtype)


# ---------------- Path B: M/N/K tiled kernels (large weights) ----------------
def _linear_tiled_kernel_f32out(x_ref, w_ref, b_ref, o_ref):
    # f32 output: accumulate directly into the resident output block (no scratch).
    k = pl.program_id(2)

    @pl.when(k == 0)
    def _():
        o_ref[...] = jnp.zeros_like(o_ref) + b_ref[...].astype(jnp.float32)

    o_ref[...] += jnp.dot(x_ref[...], w_ref[...],
                          preferred_element_type=jnp.float32)


def _linear_tiled_kernel_acc(x_ref, w_ref, b_ref, o_ref, acc_ref):
    # Low-precision output: keep an f32 VMEM accumulator, finalize on the last k.
    k = pl.program_id(2)

    @pl.when(k == 0)
    def _():
        acc_ref[...] = jnp.zeros_like(acc_ref) + b_ref[...].astype(jnp.float32)

    acc_ref[...] += jnp.dot(x_ref[...], w_ref[...],
                            preferred_element_type=jnp.float32)

    @pl.when(k == pl.num_programs(2) - 1)
    def _():
        o_ref[...] = acc_ref[...].astype(o_ref.dtype)


def pallas_linear(x2d, w, b, *, compute_dtype=None, force_tiled=False):
    """y = x2d @ w + b.

    x2d: (N, F_in), w: (F_in, F_out), b: (F_out,) -> (N, F_out) in x2d's dtype.
    compute_dtype: optional cast of x/w (e.g. jnp.bfloat16) for full MXU rate;
    default keeps the operands' own dtype (f32 stays f32 — exact nn.Linear semantics).
    """
    N, F_in = x2d.shape
    F_in_w, F_out = w.shape
    assert F_in_w == F_in and b.shape == (F_out,)
    out_dtype = x2d.dtype

    if compute_dtype is not None:
        x2d = x2d.astype(compute_dtype)
        w = w.astype(compute_dtype)

    xbytes = x2d.dtype.itemsize
    wbytes = w.dtype.itemsize
    obytes = jnp.dtype(out_dtype).itemsize

    tm = _pick_tm(N)
    m_tiles = _cdiv(N, tm)
    b2 = b.reshape(1, F_out)

    # ---------- Path A: fully resident weight, zero padding/copies ----------
    resident_budget = (2 * tm * F_in * xbytes            # x blocks (double-buffered)
                       + 2 * F_in * F_out * wbytes       # weight (counted x2, conservative)
                       + 2 * tm * F_out * obytes         # output blocks
                       + 2 * F_out * b.dtype.itemsize)   # bias
    if not force_tiled and resident_budget <= 40 * 2**20:
        cp = dict(dimension_semantics=("parallel",))
        if resident_budget > 12 * 2**20:     # v5e default scoped limit is 16 MiB
            cp["vmem_limit_bytes"] = min(48 * 2**20,
                                         int(resident_budget * 1.25) + (4 << 20))
        return pl.pallas_call(
            _linear_resident_kernel,
            out_shape=jax.ShapeDtypeStruct((N, F_out), out_dtype),
            grid_spec=pltpu.PrefetchScalarGridSpec(
                num_scalar_prefetch=0,
                grid=(m_tiles,),
                in_specs=[
                    pl.BlockSpec((tm, F_in), lambda i: (i, 0)),
                    pl.BlockSpec((F_in, F_out), lambda i: (0, 0)),   # resident
                    pl.BlockSpec((1, F_out), lambda i: (0, 0)),      # resident
                ],
                out_specs=pl.BlockSpec((tm, F_out), lambda i: (i, 0)),
            ),
            compiler_params=pltpu.CompilerParams(**cp),
        )(x2d, w, b2)

    # ---------- Path B: M/N/K tiled with resident accumulator ----------
    Kp = _round_up(F_in, 128)
    Fp = _round_up(F_out, 128)
    tk = _pick_div(Kp, 2048)
    tn = _pick_div(Fp, 512)

    # Only feature dims are padded.  The reduction (K) dim MUST be zero-padded
    # (never masked); the row (M) dim is never padded (masked partial writes).
    x_in = x2d if Kp == F_in else jnp.zeros((N, Kp), x2d.dtype).at[:, :F_in].set(x2d)
    w_in = (w if (Kp == F_in and Fp == F_out)
            else jnp.zeros((Kp, Fp), w.dtype).at[:F_in, :F_out].set(w))
    b_in = b2 if Fp == F_out else jnp.zeros((1, Fp), b.dtype).at[:, :F_out].set(b2)

    f32_out = (jnp.dtype(out_dtype) == jnp.dtype(jnp.float32))
    kernel = _linear_tiled_kernel_f32out if f32_out else _linear_tiled_kernel_acc
    scratch = [] if f32_out else [pltpu.VMEM((tm, tn), jnp.float32)]

    budget = (2 * tm * tk * xbytes + 2 * tk * tn * wbytes
              + 2 * tm * tn * obytes + (0 if f32_out else tm * tn * 4))
    cp = dict(dimension_semantics=("parallel", "parallel", "arbitrary"))
    if budget > 12 * 2**20:
        cp["vmem_limit_bytes"] = min(48 * 2**20, int(budget * 1.25) + (4 << 20))

    # TODO(synk): if profiling shows exposed per-k DMA, add pipeline_mode=pl.Buffered(3)
    # to the x/w BlockSpecs (watch v7x's 64 MiB VMEM).
    out_p = pl.pallas_call(
        kernel,
        out_shape=jax.ShapeDtypeStruct((N, Fp), out_dtype),
        grid_spec=pltpu.PrefetchScalarGridSpec(
            num_scalar_prefetch=0,
            grid=(m_tiles, Fp // tn, Kp // tk),
            in_specs=[
                pl.BlockSpec((tm, tk), lambda i, j, k: (i, k)),
                pl.BlockSpec((tk, tn), lambda i, j, k: (k, j)),
                pl.BlockSpec((1, tn), lambda i, j, k: (0, j)),
            ],
            out_specs=pl.BlockSpec((tm, tn), lambda i, j, k: (i, j)),
            scratch_shapes=scratch,
        ),
        compiler_params=pltpu.CompilerParams(**cp),
    )(x_in, w_in, b_in)

    return out_p if Fp == F_out else out_p[:, :F_out]


def seqwrap_forward_tensor(t, w, b, **kw):
    """SeqWrap._forward_tensor with m = Linear(F_in, F_out): (T,B,F_in) -> (T,B,F_out)."""
    T, B = t.shape[:2]
    x2d = t.reshape(T * B, t.shape[-1])
    y2d = pallas_linear(x2d, w, b, **kw)
    return y2d.reshape(T, B, y2d.shape[-1])


def seqwrap_forward_seqcat(data, lengths, w, b, **kw):
    """SeqWrap._forward_seqcat: m applied to concatenated data; lengths pass through."""
    return pallas_linear(data, w, b, **kw), lengths


if __name__ == "__main__":
    key = jax.random.PRNGKey(0)
    k_x, k_w, k_b, k_d = jax.random.split(key, 4)

    # small shapes: seq=8, batch=2, hidden=32
    T, B, F_in, F_out = 8, 2, 32, 32
    bound = 1.0 / (F_in ** 0.5)
    w = jax.random.uniform(k_w, (F_in, F_out), jnp.float32, -bound, bound)
    b = jax.random.uniform(k_b, (F_out,), jnp.float32, -bound, bound)

    # --- Tensor path (f32, resident-weight fast path, zero padding copies) ---
    x = jax.random.normal(k_x, (T, B, F_in), jnp.float32)
    y = jax.block_until_ready(seqwrap_forward_tensor(x, w, b))
    y_ref = (x.reshape(T * B, F_in) @ w + b).reshape(T, B, F_out)
    assert y.shape == (T, B, F_out)
    assert jnp.allclose(y, y_ref, atol=1e-5, rtol=1e-5)

    # --- SequenceCat path (N=13 rows exercises the masked partial row block) ---
    lengths = jnp.array([7, 6], dtype=jnp.int32)
    N = int(lengths.sum())
    data = jax.random.normal(k_d, (N, F_in), jnp.float32)
    yd, lens_out = seqwrap_forward_seqcat(data, lengths, w, b)
    yd = jax.block_until_ready(yd)
    yd_ref = data @ w + b
    assert yd.shape == (N, F_out)
    assert jnp.allclose(yd, yd_ref, atol=1e-5, rtol=1e-5)
    assert jnp.array_equal(lens_out, lengths)

    # --- bf16 operands hit the bf16 MXU path directly (opt-in numerics) ---
    y_bf = jax.block_until_ready(
        seqwrap_forward_tensor(x.astype(jnp.bfloat16), w.astype(jnp.bfloat16),
                               b.astype(jnp.bfloat16)))
    assert y_bf.dtype == jnp.bfloat16
    assert jnp.allclose(y_bf.astype(jnp.float32), y_ref, atol=0.2, rtol=0.05)

    # --- force the large-weight tiled fallback (K/F padding + direct-f32 accumulate) ---
    yt = jax.block_until_ready(pallas_linear(data, w, b, force_tiled=True))
    assert jnp.allclose(yt, yd_ref, atol=1e-5, rtol=1e-5)

    print("KERNEL_OK")
</pallas_src>

<mosaic_0001>
module attributes {stable_mosaic.version = 11 : i64} {
  func.func @_linear_resident_kernel(%arg0: i32, %arg1: memref<16x32xf32, #tpu.memory_space<vmem>>, %arg2: memref<32x32xf32, #tpu.memory_space<vmem>>, %arg3: memref<1x32xf32, #tpu.memory_space<vmem>>, %arg4: memref<16x32xf32, #tpu.memory_space<vmem>>) attributes {dimension_semantics = [#tpu.dimension_semantics<parallel>], iteration_bounds = array<i64: 1>, scalar_prefetch = 0 : i64, scratch_operands = 0 : i64, tpu.core_type = #tpu.core_type<tc>, window_params = [{transform_indices = @transform_0, window_bounds = array<i64: 16, 32>}, {pipeline_mode = #tpu.pipeline_mode<synchronous>, transform_indices = @transform_1, window_bounds = array<i64: 32, 32>}, {pipeline_mode = #tpu.pipeline_mode<synchronous>, transform_indices = @transform_2, window_bounds = array<i64: 1, 32>}, {transform_indices = @transform_3, window_bounds = array<i64: 16, 32>}]} {
    %c0 = arith.constant 0 : index
    %c0_0 = arith.constant 0 : index
    %0 = vector.load %arg1[%c0, %c0_0] : memref<16x32xf32, #tpu.memory_space<vmem>>, vector<16x32xf32>
    %c0_1 = arith.constant 0 : index
    %c0_2 = arith.constant 0 : index
    %1 = vector.load %arg2[%c0_1, %c0_2] : memref<32x32xf32, #tpu.memory_space<vmem>>, vector<32x32xf32>
    %cst = arith.constant dense<0.000000e+00> : vector<16x32xf32>
    %2 = tpu.matmul %0, %1, %cst {dimension_numbers = #tpu.dot_dimension_numbers<[1], [0], [0], [1], [0, 0, 1, 1], [], []>} : vector<16x32xf32>, vector<32x32xf32>, vector<16x32xf32> -> vector<16x32xf32>
    %c0_3 = arith.constant 0 : index
    %c0_4 = arith.constant 0 : index
    %3 = vector.load %arg3[%c0_3, %c0_4] : memref<1x32xf32, #tpu.memory_space<vmem>>, vector<1x32xf32>
    %4 = vector.broadcast %3 : vector<1x32xf32> to vector<16x32xf32>
    %5 = arith.addf %2, %4 : vector<16x32xf32>
    %c0_5 = arith.constant 0 : index
    %c0_6 = arith.constant 0 : index
    %6 = vector.load %arg4[%c0_5, %c0_6] : memref<16x32xf32, #tpu.memory_space<vmem>>, vector<16x32xf32>
    tpu.vector_store %arg4[%c0_5, %c0_6], %5 {strides = array<i32>} : memref<16x32xf32, #tpu.memory_space<vmem>>, vector<16x32xf32>,
    return
  }
  func.func @transform_0(%arg0: i32) -> (i32, i32) {
    %c0_i32 = arith.constant 0 : i32
    %c0_i32_0 = arith.constant 0 : i32
    return %arg0, %c0_i32 : i32, i32
  }
  func.func @transform_1(%arg0: i32) -> (i32, i32) {
    %c0_i32 = arith.constant 0 : i32
    %c0_i32_0 = arith.constant 0 : i32
    %c0_i32_1 = arith.constant 0 : i32
    return %c0_i32, %c0_i32_0 : i32, i32
  }
  func.func @transform_2(%arg0: i32) -> (i32, i32) {
    %c0_i32 = arith.constant 0 : i32
    %c0_i32_0 = arith.constant 0 : i32
    %c0_i32_1 = arith.constant 0 : i32
    return %c0_i32, %c0_i32_0 : i32, i32
  }
  func.func @transform_3(%arg0: i32) -> (i32, i32) {
    %c0_i32 = arith.constant 0 : i32
    %c0_i32_0 = arith.constant 0 : i32
    return %arg0, %c0_i32 : i32, i32
  }
}

</mosaic_0001>

<bundles_post_ra>
// kernel: tpu_custom_call.1
= control target key start
LH: loop header
LB: loop body
LE: loop exit
PB: predicated region body
PF: predicated region fallthrough
CT: control target
= control target key end

     0   :  { %8 = vsyncpa [#allocation3], 0  ;;  %s249_s0 = inlined_call_operand.hbm [shape: f32[16,32], index: 0, kind: input, shape index: {}]   ;;  %s250_s1 = inlined_call_operand.hbm [shape: f32[32,32], index: 1, kind: input, shape index: {}]   ;;  %s251_s2 = inlined_call_operand.vmem [shape: f32[1,32], index: 2, kind: input, shape index: {}]   ;;  %s252_s3 = inlined_call_operand.hbm [shape: f32[16,32], index: 3, kind: output, shape index: {}]  }
   0x1   :  { %9 = vsyncpa [#allocation6], 0 }
   0x2   :  { %10 = vsyncpa [#allocation4], 0  ;;  %s15_s14 = sshll.u32 %s249_s0, 4  ;;  %s199_s15 = smov [#allocation2]   ;;  %s16_s14 = int_to_ptr.hbm [resolvable:$true] %s15_s14 }
   0x3   :  { %s17_s16 = sshll.u32 %s199_s15, 4  ;;  %s28_s19 = sshll.u32 %s250_s1, 4  ;;  %s18_s16 = int_to_ptr.vmem [resolvable:$true] %s17_s16  ;;  %s29_s19 = int_to_ptr.hbm [resolvable:$true] %s28_s19 }
   0x4   :  { %s200_s20 = smov 128   ;;  %s201_s21 = smov 8  }
   0x5   :  { %23 = dma.hbm_to_vmem [thread:$0]  %s16_s14, 256, %s18_s16, [#allocation3], %s200_s20, %s200_s20, %s201_s21  }
   0x6   :  { %s202_s22 = smov [#allocation5]  }
   0x7   :  { %s30_s23 = sshll.u32 %s202_s22, 4  ;;  %s31_s23 = int_to_ptr.vmem [resolvable:$true] %s30_s23 }
   0x8   :  { %36 = dma.hbm_to_vmem [thread:$0]  %s29_s19, 512, %s31_s23, [#allocation6], %s200_s20, %s200_s20, %s201_s21  }
   0x9   :  { %193 = dma.done.wait [#allocation3], 256  }
   0xa   :  { %194 = vsyncadd [#allocation3], 4294967040 }
   0xb   :  { %195 = dma.done.wait [#allocation6], 512  }
   0xc   :  { %196 = vsyncadd [#allocation6], 4294966784  ;;  %v52_v0 = vld [vmem:[#allocation5 + $0x18] sm:$0xff]  ;;  %v51_v1 = vld [vmem:[#allocation5 + $0x10] sm:$0xff]  ;;  %vm57_vm0 = vcmask 261120   ;;  %s203_s24 = smov [#allocation7]  }
   0xd   :  { %76 = vmatpush.msra.mxu0 %v52_v0  ;;  %111 = vmatpush.msra.mxu1 %v52_v0  ;;  %v50_v2 = vld [vmem:[#allocation5 + $0x8] sm:$0xff]  ;;  %v49_v3 = vld [vmem:[#allocation5] sm:$0xff]  ;;  %v47_v4 = vld [vmem:[#allocation2] sm:$0xff]  ;;  %s93_s25 = sshll.u32 %s203_s24, 4  ;;  %s95_s28 = sshll.u32 %s252_s3, 4  ;;  %s94_s25 = int_to_ptr.vmem [resolvable:$true] %s93_s25  ;;  %s96_s28 = int_to_ptr.hbm [resolvable:$true] %s95_s28 }
   0xe   :  { %v48_v5 = vld [vmem:[#allocation2 + $0x8] sm:$0xff]  ;;  %v120_v6 = vld [vmem:[%s251_s2] ss:$0 sm:$0xff] }
   0xf   :  { %77 = vmatpush.msra.mxu0 %v51_v1  ;;  %112 = vmatpush.msra.mxu1 %v51_v1 }
  0x11   :  { %78 = vmatpush.msra.mxu0 %v50_v2  ;;  %113 = vmatpush.msra.mxu1 %v50_v2 }
  0x13   :  { %79 = vmatpush.msra.mxu0 %v49_v3  ;;  %114 = vmatpush.msra.mxu1 %v49_v3 }
  0x14   :  { %109 = vmatmul.msk.f32.vlgmr.msra.gmra.mxu0 %vm57_vm0, %v47_v4  ;;  %110 = vmatmul.msk.f32.vlgmr.msra.gmra.mxu1 %vm57_vm0, %v48_v5 }
  0x91   :  { %v81_v7 = vpop.f32.mrf.mxu0  ;;  %v84_v8 = vpop.f32.mrf.mxu1 }
  0x92   :  { %v82_v9 = vadd.f32 %v120_v6, %v81_v7  ;;  %v85_v10 = vadd.f32 %v120_v6, %v84_v8 }
  0x94   :  { %87 = vst.msk [vmem:[#allocation7] sm:$0xff] %vm57_vm0, %v82_v9 }
  0x95   :  { %88 = vst.msk [vmem:[#allocation7 + $0x8] sm:$0xff] %vm57_vm0, %v85_v10 }
  0x96   :  { %101 = dma.vmem_to_hbm [thread:$0]  %s94_s25, 256, %s96_s28, [#allocation4], %s200_s20, %s200_s20, %s201_s21  }
  0x97   :  { %197 = dma.done.wait [#allocation4], 256  }
  0x98   :  { %198 = vsyncadd [#allocation4], 4294967040 }
  0x99   :  { %106 = vsyncpa [#allocation3], 1 }
  0x9a   :  { %107 = vsyncpa [#allocation6], 1 }
  0x9b   :  { %108 = vsyncpa [#allocation4], 1 }

</bundles_post_ra>
